<compile_context>
chip_gen: v7x
topology: tpu7x:2x2x1
jax: 0.10.0
libtpu: 0.0.40
codegen_flags: <defaults>
</compile_context>

<pallas_src>
import jax
import jax.numpy as jnp
import numpy as np
from jax.experimental import pallas as pl
from jax.experimental.pallas import tpu as pltpu


def _make_kernel(B, H, W, Cin, Cmid):
    K = 3 * W * Cin      # contraction depth of the fused 3x3 conv matmul
    N2 = W * Cin         # folded output width (lane axis)

    def kernel(xpad_ref, a_ref, w2b_ref, b1_ref, b2_ref, o_ref):
        # xpad_ref: (B, H+2, W*Cin) f32   row-padded, W*Cin folded on lanes
        # a_ref   : (3*W*Cin, W*Cmid) bf16  banded 3x3-conv matrix
        # w2b_ref : (W*Cmid, W*Cin)  bf16  block-diagonal 1x1-conv matrix
        # b1_ref  : (1, W*Cmid) f32 ; b2_ref: (1, W*Cin) f32
        # o_ref   : (B*H, W*Cin) f32
        # ReLU(0) == 0, so applying ReLU to the zero-padded rows is harmless.
        slabs = [jnp.maximum(xpad_ref[:, dy:dy + H, :], 0.0) for dy in range(3)]
        lhs = jnp.concatenate(slabs, axis=-1).reshape(B * H, K)          # (B*H, 3*W*Cin)

        h = jax.lax.dot_general(                                          # 3x3 conv
            lhs.astype(jnp.bfloat16), a_ref[...],
            dimension_numbers=(((1,), (0,)), ((), ())),
            preferred_element_type=jnp.float32)                           # (B*H, W*Cmid)
        h = jnp.maximum(h + b1_ref[...], 0.0)

        y = jax.lax.dot_general(                                          # 1x1 conv
            h.astype(jnp.bfloat16), w2b_ref[...],
            dimension_numbers=(((1,), (0,)), ((), ())),
            preferred_element_type=jnp.float32)                           # (B*H, W*Cin)
        y = y + b2_ref[...]

        res = xpad_ref[:, 1:H + 1, :].reshape(B * H, N2)   # original (non-ReLU) input
        o_ref[...] = (y + res).astype(o_ref.dtype)

    return kernel


def resblock_forward(x_nchw, w1, b1, w2, b2):
    """x_nchw: (B, Cin, H, W) f32; w1: (3,3,Cin,Cmid) HWIO; b1: (Cmid,); w2: (Cmid,Cin); b2: (Cin,)."""
    B, Cin, H, W = x_nchw.shape
    Cmid = w1.shape[-1]

    # NCHW -> NHWC -> fold (W, Cin) onto the lane axis; zero-pad one row top/bottom only.
    x = jnp.transpose(x_nchw, (0, 2, 3, 1)).reshape(B, H, W * Cin)
    xpad = jnp.pad(x, ((0, 0), (1, 1), (0, 0)))

    # Banded 3x3-conv matrix: A[(dy*W + p)*Cin + ci, w*Cmid + cm] = w1[dy, dx, ci, cm]
    # where p == w + dx - 1 (zero otherwise) -> the shifted identities encode the
    # horizontal zero padding exactly.
    a_mat = jnp.concatenate(
        [sum(jnp.kron(jnp.eye(W, W, k=1 - dx, dtype=w1.dtype), w1[dy, dx])
             for dx in range(3))
         for dy in range(3)], axis=0)                      # (3*W*Cin, W*Cmid)
    w2_blk = jnp.kron(jnp.eye(W, dtype=w2.dtype), w2)      # (W*Cmid, W*Cin) block-diag
    b1_f = jnp.tile(b1.reshape(-1), W).reshape(1, W * Cmid)
    b2_f = jnp.tile(b2.reshape(-1), W).reshape(1, W * Cin)

    M, K, N1, N2 = B * H, 3 * W * Cin, W * Cmid, W * Cin
    cost = pl.CostEstimate(
        flops=2 * M * K * N1 + 2 * M * N1 * N2,
        transcendentals=0,
        bytes_accessed=(xpad.size * 4 + a_mat.size * 2 + w2_blk.size * 2
                        + b1_f.size * 4 + b2_f.size * 4 + M * N2 * 4))

    out = pl.pallas_call(
        _make_kernel(B, H, W, Cin, Cmid),
        out_shape=jax.ShapeDtypeStruct((M, N2), x_nchw.dtype),
        grid=(1,),
        in_specs=[
            pl.BlockSpec((B, H + 2, W * Cin), lambda i: (0, 0, 0)),
            pl.BlockSpec((K, N1), lambda i: (0, 0)),
            pl.BlockSpec((N1, N2), lambda i: (0, 0)),
            pl.BlockSpec((1, N1), lambda i: (0, 0)),
            pl.BlockSpec((1, N2), lambda i: (0, 0)),
        ],
        out_specs=pl.BlockSpec((M, N2), lambda i: (0, 0)),
        compiler_params=pltpu.CompilerParams(dimension_semantics=("arbitrary",)),
        cost_estimate=cost,
    )(xpad, a_mat.astype(jnp.bfloat16), w2_blk.astype(jnp.bfloat16), b1_f, b2_f)

    # (B*H, W*Cin) -> (B, H, W, Cin) -> NCHW
    return jnp.transpose(out.reshape(B, H, W, Cin), (0, 3, 1, 2))


def ref_forward(x_nchw, w1, b1, w2, b2):
    """Pure-JAX f32 reference matching the PyTorch ResBlock forward."""
    y = jnp.maximum(x_nchw, 0.0)
    y = jax.lax.conv_general_dilated(
        y, w1, (1, 1), 'SAME',
        dimension_numbers=('NCHW', 'HWIO', 'NCHW'),
        precision=jax.lax.Precision.HIGHEST)
    y = y + b1.reshape(1, -1, 1, 1)
    y = jnp.maximum(y, 0.0)
    w2_hwio = w2.reshape(1, 1, w2.shape[0], w2.shape[1])
    z = jax.lax.conv_general_dilated(
        y, w2_hwio, (1, 1), 'SAME',
        dimension_numbers=('NCHW', 'HWIO', 'NCHW'),
        precision=jax.lax.Precision.HIGHEST)
    z = z + b2.reshape(1, -1, 1, 1)
    return z + x_nchw


if __name__ == "__main__":
    # Shapes consistent with ResBlock(in_channel=4, channel=8)
    B, Cin, H, W = 2, 4, 16, 16
    Cmid = 8

    key = jax.random.PRNGKey(0)
    k_x, k_w1, k_b1, k_w2, k_b2 = jax.random.split(key, 5)

    x = jax.random.normal(k_x, (B, Cin, H, W), jnp.float32)
    w1 = jax.random.normal(k_w1, (3, 3, Cin, Cmid), jnp.float32) * (1.0 / np.sqrt(3 * 3 * Cin))
    b1 = jax.random.normal(k_b1, (Cmid,), jnp.float32) * 0.1
    w2 = jax.random.normal(k_w2, (Cmid, Cin), jnp.float32) * (1.0 / np.sqrt(Cmid))
    b2 = jax.random.normal(k_b2, (Cin,), jnp.float32) * 0.1

    fwd = jax.jit(resblock_forward)
    out = jax.block_until_ready(fwd(x, w1, b1, w2, b2))
    ref = jax.block_until_ready(ref_forward(x, w1, b1, w2, b2))

    # bf16 MXU operands with f32 accumulation (per perf review) => ~1e-2-level absolute
    # error vs the f32 HIGHEST-precision reference, hence the loosened tolerance.
    np.testing.assert_allclose(np.asarray(out), np.asarray(ref), rtol=5e-2, atol=5e-2)
    print("KERNEL_OK")
</pallas_src>

<mosaic_0001>
module attributes {stable_mosaic.version = 11 : i64} {
  func.func @kernel(%arg0: i32, %arg1: memref<2x18x64xf32, #tpu.memory_space<vmem>>, %arg2: memref<192x128xbf16, #tpu.memory_space<vmem>>, %arg3: memref<128x64xbf16, #tpu.memory_space<vmem>>, %arg4: memref<1x128xf32, #tpu.memory_space<vmem>>, %arg5: memref<1x64xf32, #tpu.memory_space<vmem>>, %arg6: memref<32x64xf32, #tpu.memory_space<vmem>>) attributes {dimension_semantics = [#tpu.dimension_semantics<arbitrary>], iteration_bounds = array<i64: 1>, scalar_prefetch = 0 : i64, scratch_operands = 0 : i64, tpu.core_type = #tpu.core_type<tc>, window_params = [{pipeline_mode = #tpu.pipeline_mode<synchronous>, transform_indices = @transform_0, window_bounds = array<i64: 2, 18, 64>}, {pipeline_mode = #tpu.pipeline_mode<synchronous>, transform_indices = @transform_1, window_bounds = array<i64: 192, 128>}, {pipeline_mode = #tpu.pipeline_mode<synchronous>, transform_indices = @transform_2, window_bounds = array<i64: 128, 64>}, {pipeline_mode = #tpu.pipeline_mode<synchronous>, transform_indices = @transform_3, window_bounds = array<i64: 1, 128>}, {pipeline_mode = #tpu.pipeline_mode<synchronous>, transform_indices = @transform_4, window_bounds = array<i64: 1, 64>}, {pipeline_mode = #tpu.pipeline_mode<synchronous>, transform_indices = @transform_5, window_bounds = array<i64: 32, 64>}]} {
    %c0 = arith.constant 0 : index
    %c0_0 = arith.constant 0 : index
    %c0_1 = arith.constant 0 : index
    %0 = vector.load %arg1[%c0, %c0_0, %c0_1] : memref<2x18x64xf32, #tpu.memory_space<vmem>>, vector<2x16x64xf32>
    %cst = arith.constant 0.000000e+00 : f32
    %1 = vector.broadcast %cst : f32 to vector<2x16x64xf32>
    %2 = arith.maximumf %0, %1 : vector<2x16x64xf32>
    %c0_2 = arith.constant 0 : index
    %c1 = arith.constant 1 : index
    %c0_3 = arith.constant 0 : index
    %3 = vector.load %arg1[%c0_2, %c1, %c0_3] : memref<2x18x64xf32, #tpu.memory_space<vmem>>, vector<2x16x64xf32>
    %cst_4 = arith.constant 0.000000e+00 : f32
    %4 = vector.broadcast %cst_4 : f32 to vector<2x16x64xf32>
    %5 = arith.maximumf %3, %4 : vector<2x16x64xf32>
    %c0_5 = arith.constant 0 : index
    %c2 = arith.constant 2 : index
    %c0_6 = arith.constant 0 : index
    %6 = vector.load %arg1[%c0_5, %c2, %c0_6] : memref<2x18x64xf32, #tpu.memory_space<vmem>>, vector<2x16x64xf32>
    %cst_7 = arith.constant 0.000000e+00 : f32
    %7 = vector.broadcast %cst_7 : f32 to vector<2x16x64xf32>
    %8 = arith.maximumf %6, %7 : vector<2x16x64xf32>
    %9 = tpu.concatenate %2, %5, %8 in 2 : vector<2x16x64xf32>, vector<2x16x64xf32>, vector<2x16x64xf32> -> vector<2x16x192xf32>
    %10 = vector.shape_cast %9 : vector<2x16x192xf32> to vector<32x192xf32>
    %11 = arith.truncf %10 : vector<32x192xf32> to vector<32x192xbf16>
    %c0_8 = arith.constant 0 : index
    %c0_9 = arith.constant 0 : index
    %12 = vector.load %arg2[%c0_8, %c0_9] : memref<192x128xbf16, #tpu.memory_space<vmem>>, vector<192x128xbf16>
    %cst_10 = arith.constant dense<0.000000e+00> : vector<32x128xf32>
    %13 = tpu.matmul %11, %12, %cst_10 {dimension_numbers = #tpu.dot_dimension_numbers<[1], [0], [0], [1], [0, 0, 1, 1], [], []>} : vector<32x192xbf16>, vector<192x128xbf16>, vector<32x128xf32> -> vector<32x128xf32>
    %c0_11 = arith.constant 0 : index
    %c0_12 = arith.constant 0 : index
    %14 = vector.load %arg4[%c0_11, %c0_12] : memref<1x128xf32, #tpu.memory_space<vmem>>, vector<1x128xf32>
    %15 = vector.broadcast %14 : vector<1x128xf32> to vector<32x128xf32>
    %16 = arith.addf %13, %15 : vector<32x128xf32>
    %cst_13 = arith.constant 0.000000e+00 : f32
    %17 = vector.broadcast %cst_13 : f32 to vector<32x128xf32>
    %18 = arith.maximumf %16, %17 : vector<32x128xf32>
    %19 = arith.truncf %18 : vector<32x128xf32> to vector<32x128xbf16>
    %c0_14 = arith.constant 0 : index
    %c0_15 = arith.constant 0 : index
    %20 = vector.load %arg3[%c0_14, %c0_15] : memref<128x64xbf16, #tpu.memory_space<vmem>>, vector<128x64xbf16>
    %cst_16 = arith.constant dense<0.000000e+00> : vector<32x64xf32>
    %21 = tpu.matmul %19, %20, %cst_16 {dimension_numbers = #tpu.dot_dimension_numbers<[1], [0], [0], [1], [0, 0, 1, 1], [], []>} : vector<32x128xbf16>, vector<128x64xbf16>, vector<32x64xf32> -> vector<32x64xf32>
    %c0_17 = arith.constant 0 : index
    %c0_18 = arith.constant 0 : index
    %22 = vector.load %arg5[%c0_17, %c0_18] : memref<1x64xf32, #tpu.memory_space<vmem>>, vector<1x64xf32>
    %23 = vector.broadcast %22 : vector<1x64xf32> to vector<32x64xf32>
    %24 = arith.addf %21, %23 : vector<32x64xf32>
    %c0_19 = arith.constant 0 : index
    %c1_20 = arith.constant 1 : index
    %c0_21 = arith.constant 0 : index
    %25 = vector.load %arg1[%c0_19, %c1_20, %c0_21] : memref<2x18x64xf32, #tpu.memory_space<vmem>>, vector<2x16x64xf32>
    %26 = vector.shape_cast %25 : vector<2x16x64xf32> to vector<32x64xf32>
    %27 = arith.addf %24, %26 : vector<32x64xf32>
    %c0_22 = arith.constant 0 : index
    %c0_23 = arith.constant 0 : index
    %28 = vector.load %arg6[%c0_22, %c0_23] : memref<32x64xf32, #tpu.memory_space<vmem>>, vector<32x64xf32>
    tpu.vector_store %arg6[%c0_22, %c0_23], %27 {strides = array<i32>} : memref<32x64xf32, #tpu.memory_space<vmem>>, vector<32x64xf32>,
    return
  }
  func.func @transform_0(%arg0: i32) -> (i32, i32, i32) {
    %c0_i32 = arith.constant 0 : i32
    %c0_i32_0 = arith.constant 0 : i32
    %c0_i32_1 = arith.constant 0 : i32
    %c0_i32_2 = arith.constant 0 : i32
    return %c0_i32, %c0_i32_0, %c0_i32_1 : i32, i32, i32
  }
  func.func @transform_1(%arg0: i32) -> (i32, i32) {
    %c0_i32 = arith.constant 0 : i32
    %c0_i32_0 = arith.constant 0 : i32
    %c0_i32_1 = arith.constant 0 : i32
    return %c0_i32, %c0_i32_0 : i32, i32
  }
  func.func @transform_2(%arg0: i32) -> (i32, i32) {
    %c0_i32 = arith.constant 0 : i32
    %c0_i32_0 = arith.constant 0 : i32
    %c0_i32_1 = arith.constant 0 : i32
    return %c0_i32, %c0_i32_0 : i32, i32
  }
  func.func @transform_3(%arg0: i32) -> (i32, i32) {
    %c0_i32 = arith.constant 0 : i32
    %c0_i32_0 = arith.constant 0 : i32
    %c0_i32_1 = arith.constant 0 : i32
    return %c0_i32, %c0_i32_0 : i32, i32
  }
  func.func @transform_4(%arg0: i32) -> (i32, i32) {
    %c0_i32 = arith.constant 0 : i32
    %c0_i32_0 = arith.constant 0 : i32
    %c0_i32_1 = arith.constant 0 : i32
    return %c0_i32, %c0_i32_0 : i32, i32
  }
  func.func @transform_5(%arg0: i32) -> (i32, i32) {
    %c0_i32 = arith.constant 0 : i32
    %c0_i32_0 = arith.constant 0 : i32
    %c0_i32_1 = arith.constant 0 : i32
    return %c0_i32, %c0_i32_0 : i32, i32
  }
}

</mosaic_0001>

<bundles_post_ra>
// kernel: tile.13
= control target key start
LH: loop header
LB: loop body
LE: loop exit
PB: predicated region body
PF: predicated region fallthrough
CT: control target
= control target key end

     0   :  { %s28_s0 = inlined_call_operand.vmem [shape: f32[8], index: 0, kind: input, shape index: {}]   ;;  %s29_s1 = inlined_call_operand.vmem [shape: f32[16,8], index: 1, kind: output, shape index: {}]  }
   0x1   :  { %v4_v0 = vld [vmem:[%s28_s0] ss:$0 sm:$0xff] }
   0x2   :  { %5 = vst [vmem:[%s29_s1] sm:$0xff] %v4_v0  ;;  %8 = vst [vmem:[%s29_s1 + $0x8] sm:$0xff] %v4_v0 }

// kernel: tile.14
= control target key start
LH: loop header
LB: loop body
LE: loop exit
PB: predicated region body
PF: predicated region fallthrough
CT: control target
= control target key end

     0   :  { %s131_s10 = smov 120   ;;  %s132_s11 = smov 104   ;;  %vm3_vm0 = vcmask 64512   ;;  %vm9_vm1 = vcmask 1048512   ;;  %vm15_vm2 = vcmask 982912   ;;  %vm21_vm3 = vcmask 917312   ;;  %s207_s0 = inlined_call_operand.vmem [shape: f32[16,8], index: 0, kind: input, shape index: {}]   ;;  %s208_s1 = inlined_call_operand.vmem [shape: f32[1,128], index: 1, kind: output, shape index: {}]  }
   0x1   :  { %v101_v0 = vld [vmem:[%s207_s0 + $0xf] sm:$0x1]   ;;  %v103_v1 = vld [vmem:[%s207_s0 + $0xd] sm:$0x1]   ;;  %v102_v2 = vld [vmem:[%s207_s0 + $0xe] sm:$0x1]  }
   0x2   :  { %7 = vrot.lane.b32.xlu0 %v101_v0, %s131_s10  ;;  %19 = vrot.lane.b32.xlu1 %v103_v1, %s132_s11  ;;  %v104_v3 = vld [vmem:[%s207_s0 + $0xc] sm:$0x1]   ;;  %s133_s16 = smov 112   ;;  %s134_s17 = smov 96   ;;  %v105_v4 = vld [vmem:[%s207_s0 + $0xb] sm:$0x1]  }
   0x3   :  { %v106_v5 = vld [vmem:[%s207_s0 + $0xa] sm:$0x1]   ;;  %v2_v6 = vld [vmem:[%s207_s0] sm:$0x1]   ;;  %s135_s24 = smov 88   ;;  %s136_s25 = smov 80  }
   0x4   :  { %4 = vst.msk [vmem:[#allocation0] sm:$0x1] %vm3_vm0, %v2_v6   ;;  %v107_v7 = vld [vmem:[%s207_s0 + $0x9] sm:$0x1]   ;;  %v108_v8 = vld [vmem:[%s207_s0 + $0x8] sm:$0x1]  }
   0x5   :  { %s137_s30 = smov 72   ;;  %s138_s2 = smov 64   ;;  %v109_v9 = vld [vmem:[%s207_s0 + $0x7] sm:$0x1]   ;;  %v110_v10 = vld [vmem:[%s207_s0 + $0x6] sm:$0x1]  }
   0x6   :  { %13 = vrot.lane.b32.xlu0 %v102_v2, %s133_s16  ;;  %25 = vrot.lane.b32.xlu1 %v104_v3, %s134_s17  ;;  %s139_s7 = smov 56   ;;  %s140_s8 = smov 48   ;;  %v111_v11 = vld [vmem:[%s207_s0 + $0x5] sm:$0x1]   ;;  %v112_v12 = vld [vmem:[%s207_s0 + $0x4] sm:$0x1]  }
   0x7   :  { %s141_s13 = smov 40   ;;  %s142_s14 = smov 32   ;;  %v113_v13 = vld [vmem:[%s207_s0 + $0x3] sm:$0x1]   ;;  %v114_v14 = vld [vmem:[%s207_s0 + $0x2] sm:$0x1]  }
   0x8   :  { %s143_s19 = smov 24   ;;  %s144_s20 = smov 16   ;;  %v115_v15 = vld [vmem:[%s207_s0 + $0x1] sm:$0x1]   ;;  %vm27_vm4 = vcmask 851712   ;;  %vm33_vm5 = vcmask 786112  }
   0x9   :  { %s145_s0 = smov 8   ;;  %vm39_vm6 = vcmask 720512   ;;  %vm45_vm7 = vcmask 654912   ;;  %vm51_vm8 = vcmask 589312   ;;  %vm57_vm9 = vcmask 523712  }
   0xa   :  { %31 = vrot.lane.b32.xlu0 %v105_v4, %s135_s24  ;;  %37 = vrot.lane.b32.xlu1 %v106_v5, %s136_s25  ;;  %vm63_vm10 = vcmask 458112   ;;  %vm69_vm11 = vcmask 392512   ;;  %vm75_vm12 = vcmask 326912   ;;  %vm81_vm13 = vcmask 261312  }
   0xb   :  { %vm87_vm14 = vcmask 195712   ;;  %vm93_vm15 = vcmask 130112  }
   0xe   :  { %43 = vrot.lane.b32.xlu0 %v107_v7, %s137_s30  ;;  %49 = vrot.lane.b32.xlu1 %v108_v8, %s138_s2 }
  0x12   :  { %55 = vrot.lane.b32.xlu0 %v109_v9, %s139_s7  ;;  %61 = vrot.lane.b32.xlu1 %v110_v10, %s140_s8 }
  0x16   :  { %67 = vrot.lane.b32.xlu0 %v111_v11, %s141_s13  ;;  %73 = vrot.lane.b32.xlu1 %v112_v12, %s142_s14 }
  0x1a   :  { %79 = vrot.lane.b32.xlu0 %v113_v13, %s143_s19  ;;  %85 = vrot.lane.b32.xlu1 %v114_v14, %s144_s20 }
  0x1e   :  { %91 = vrot.lane.b32.xlu0 %v115_v15, %s145_s0 }
  0x74   :  { %v8_v16 = vpop.permute.xlu0 %7   ;;  %v20_v17 = vpop.permute.xlu1 %19  }
  0x75   :  { %10 = vst.msk [vmem:[#allocation0] sm:$0x1] %vm9_vm1, %v8_v16  }
  0x78   :  { %v14_v18 = vpop.permute.xlu0 %13   ;;  %v26_v19 = vpop.permute.xlu1 %25  }
  0x79   :  { %16 = vst.msk [vmem:[#allocation0] sm:$0x1] %vm15_vm2, %v14_v18  }
  0x7a   :  { %22 = vst.msk [vmem:[#allocation0] sm:$0x1] %vm21_vm3, %v20_v17  }
  0x7b   :  { %28 = vst.msk [vmem:[#allocation0] sm:$0x1] %vm27_vm4, %v26_v19  }
  0x7c   :  { %v32_v20 = vpop.permute.xlu0 %31   ;;  %v38_v21 = vpop.permute.xlu1 %37  }
  0x7d   :  { %34 = vst.msk [vmem:[#allocation0] sm:$0x1] %vm33_vm5, %v32_v20  }
  0x7e   :  { %40 = vst.msk [vmem:[#allocation0] sm:$0x1] %vm39_vm6, %v38_v21  }
  0x80   :  { %v44_v22 = vpop.permute.xlu0 %43   ;;  %v50_v23 = vpop.permute.xlu1 %49  }
  0x81   :  { %46 = vst.msk [vmem:[#allocation0] sm:$0x1] %vm45_vm7, %v44_v22  }
  0x82   :  { %52 = vst.msk [vmem:[#allocation0] sm:$0x1] %vm51_vm8, %v50_v23  }
  0x84   :  { %v56_v24 = vpop.permute.xlu0 %55   ;;  %v62_v25 = vpop.permute.xlu1 %61  }
  0x85   :  { %58 = vst.msk [vmem:[#allocation0] sm:$0x1] %vm57_vm9, %v56_v24  }
  0x86   :  { %64 = vst.msk [vmem:[#allocation0] sm:$0x1] %vm63_vm10, %v62_v25  }
  0x88   :  { %v68_v26 = vpop.permute.xlu0 %67   ;;  %v74_v27 = vpop.permute.xlu1 %73  }
  0x89   :  { %70 = vst.msk [vmem:[#allocation0] sm:$0x1] %vm69_vm11, %v68_v26  }
  0x8a   :  { %76 = vst.msk [vmem:[#allocation0] sm:$0x1] %vm75_vm12, %v74_v27  }
  0x8c   :  { %v80_v28 = vpop.permute.xlu0 %79   ;;  %v86_v29 = vpop.permute.xlu1 %85  }
  0x8d   :  { %82 = vst.msk [vmem:[#allocation0] sm:$0x1] %vm81_vm13, %v80_v28  }
  0x8e   :  { %88 = vst.msk [vmem:[#allocation0] sm:$0x1] %vm87_vm14, %v86_v29  }
  0x90   :  { %v92_v30 = vpop.permute.xlu0 %91  }
  0x91   :  { %94 = vst.msk [vmem:[#allocation0] sm:$0x1] %vm93_vm15, %v92_v30  }
  0x98   :  { %v98_v31 = vld [vmem:[#allocation0] sm:$0x1] }
  0x99   :  { %100 = vst [vmem:[%s208_s1] sm:$0x1] %v98_v31 }

// kernel: tile.18
= control target key start
LH: loop header
LB: loop body
LE: loop exit
PB: predicated region body
PF: predicated region fallthrough
CT: control target
= control target key end

     0   :  { %s28_s0 = inlined_call_operand.vmem [shape: f32[4], index: 0, kind: input, shape index: {}]   ;;  %s29_s1 = inlined_call_operand.vmem [shape: f32[16,4], index: 1, kind: output, shape index: {}]  }
   0x1   :  { %v4_v0 = vld [vmem:[%s28_s0] ss:$0 sm:$0xff] }
   0x2   :  { %5 = vst [vmem:[%s29_s1] sm:$0xff] %v4_v0  ;;  %8 = vst [vmem:[%s29_s1 + $0x8] sm:$0xff] %v4_v0 }

// kernel: tile.19
= control target key start
LH: loop header
LB: loop body
LE: loop exit
PB: predicated region body
PF: predicated region fallthrough
CT: control target
= control target key end

     0   :  { %s131_s10 = smov 60   ;;  %s132_s11 = smov 52   ;;  %vm3_vm0 = vcmask 31744   ;;  %vm9_vm1 = vcmask 523744   ;;  %vm15_vm2 = vcmask 490944   ;;  %vm21_vm3 = vcmask 458144   ;;  %s207_s0 = inlined_call_operand.vmem [shape: f32[16,4], index: 0, kind: input, shape index: {}]   ;;  %s208_s1 = inlined_call_operand.vmem [shape: f32[1,64], index: 1, kind: output, shape index: {}]  }
   0x1   :  { %v101_v0 = vld [vmem:[%s207_s0 + $0xf] sm:$0x1]   ;;  %v103_v1 = vld [vmem:[%s207_s0 + $0xd] sm:$0x1]   ;;  %v102_v2 = vld [vmem:[%s207_s0 + $0xe] sm:$0x1]  }
   0x2   :  { %7 = vrot.lane.b32.xlu0 %v101_v0, %s131_s10  ;;  %19 = vrot.lane.b32.xlu1 %v103_v1, %s132_s11  ;;  %v104_v3 = vld [vmem:[%s207_s0 + $0xc] sm:$0x1]   ;;  %s133_s16 = smov 56   ;;  %s134_s17 = smov 48   ;;  %v105_v4 = vld [vmem:[%s207_s0 + $0xb] sm:$0x1]  }
   0x3   :  { %v106_v5 = vld [vmem:[%s207_s0 + $0xa] sm:$0x1]   ;;  %v2_v6 = vld [vmem:[%s207_s0] sm:$0x1]   ;;  %s135_s24 = smov 44   ;;  %s136_s25 = smov 40  }
   0x4   :  { %4 = vst.msk [vmem:[#allocation0] sm:$0x1] %vm3_vm0, %v2_v6   ;;  %v107_v7 = vld [vmem:[%s207_s0 + $0x9] sm:$0x1]   ;;  %v108_v8 = vld [vmem:[%s207_s0 + $0x8] sm:$0x1]  }
   0x5   :  { %s137_s30 = smov 36   ;;  %s138_s2 = smov 32   ;;  %v109_v9 = vld [vmem:[%s207_s0 + $0x7] sm:$0x1]   ;;  %v110_v10 = vld [vmem:[%s207_s0 + $0x6] sm:$0x1]  }
   0x6   :  { %13 = vrot.lane.b32.xlu0 %v102_v2, %s133_s16  ;;  %25 = vrot.lane.b32.xlu1 %v104_v3, %s134_s17  ;;  %s139_s7 = smov 28   ;;  %s140_s8 = smov 24   ;;  %v111_v11 = vld [vmem:[%s207_s0 + $0x5] sm:$0x1]   ;;  %v112_v12 = vld [vmem:[%s207_s0 + $0x4] sm:$0x1]  }
   0x7   :  { %s141_s13 = smov 20   ;;  %s142_s14 = smov 16   ;;  %v113_v13 = vld [vmem:[%s207_s0 + $0x3] sm:$0x1]   ;;  %v114_v14 = vld [vmem:[%s207_s0 + $0x2] sm:$0x1]  }
   0x8   :  { %s143_s19 = smov 12   ;;  %s144_s20 = smov 8   ;;  %v115_v15 = vld [vmem:[%s207_s0 + $0x1] sm:$0x1]   ;;  %vm27_vm4 = vcmask 425344   ;;  %vm33_vm5 = vcmask 392544  }
   0x9   :  { %s145_s0 = smov 4   ;;  %vm39_vm6 = vcmask 359744   ;;  %vm45_vm7 = vcmask 326944   ;;  %vm51_vm8 = vcmask 294144   ;;  %vm57_vm9 = vcmask 261344  }
   0xa   :  { %31 = vrot.lane.b32.xlu0 %v105_v4, %s135_s24  ;;  %37 = vrot.lane.b32.xlu1 %v106_v5, %s136_s25  ;;  %vm63_vm10 = vcmask 228544   ;;  %vm69_vm11 = vcmask 195744   ;;  %vm75_vm12 = vcmask 162944   ;;  %vm81_vm13 = vcmask 130144  }
   0xb   :  { %vm87_vm14 = vcmask 97344   ;;  %vm93_vm15 = vcmask 64544  }
   0xe   :  { %43 = vrot.lane.b32.xlu0 %v107_v7, %s137_s30  ;;  %49 = vrot.lane.b32.xlu1 %v108_v8, %s138_s2 }
  0x12   :  { %55 = vrot.lane.b32.xlu0 %v109_v9, %s139_s7  ;;  %61 = vrot.lane.b32.xlu1 %v110_v10, %s140_s8 }
  0x16   :  { %67 = vrot.lane.b32.xlu0 %v111_v11, %s141_s13  ;;  %73 = vrot.lane.b32.xlu1 %v112_v12, %s142_s14 }
  0x1a   :  { %79 = vrot.lane.b32.xlu0 %v113_v13, %s143_s19  ;;  %85 = vrot.lane.b32.xlu1 %v114_v14, %s144_s20 }
  0x1e   :  { %91 = vrot.lane.b32.xlu0 %v115_v15, %s145_s0 }
  0x74   :  { %v8_v16 = vpop.permute.xlu0 %7   ;;  %v20_v17 = vpop.permute.xlu1 %19  }
  0x75   :  { %10 = vst.msk [vmem:[#allocation0] sm:$0x1] %vm9_vm1, %v8_v16  }
  0x78   :  { %v14_v18 = vpop.permute.xlu0 %13   ;;  %v26_v19 = vpop.permute.xlu1 %25  }
  0x79   :  { %16 = vst.msk [vmem:[#allocation0] sm:$0x1] %vm15_vm2, %v14_v18  }
  0x7a   :  { %22 = vst.msk [vmem:[#allocation0] sm:$0x1] %vm21_vm3, %v20_v17  }
  0x7b   :  { %28 = vst.msk [vmem:[#allocation0] sm:$0x1] %vm27_vm4, %v26_v19  }
  0x7c   :  { %v32_v20 = vpop.permute.xlu0 %31   ;;  %v38_v21 = vpop.permute.xlu1 %37  }
  0x7d   :  { %34 = vst.msk [vmem:[#allocation0] sm:$0x1] %vm33_vm5, %v32_v20  }
  0x7e   :  { %40 = vst.msk [vmem:[#allocation0] sm:$0x1] %vm39_vm6, %v38_v21  }
  0x80   :  { %v44_v22 = vpop.permute.xlu0 %43   ;;  %v50_v23 = vpop.permute.xlu1 %49  }
  0x81   :  { %46 = vst.msk [vmem:[#allocation0] sm:$0x1] %vm45_vm7, %v44_v22  }
  0x82   :  { %52 = vst.msk [vmem:[#allocation0] sm:$0x1] %vm51_vm8, %v50_v23  }
  0x84   :  { %v56_v24 = vpop.permute.xlu0 %55   ;;  %v62_v25 = vpop.permute.xlu1 %61  }
  0x85   :  { %58 = vst.msk [vmem:[#allocation0] sm:$0x1] %vm57_vm9, %v56_v24  }
  0x86   :  { %64 = vst.msk [vmem:[#allocation0] sm:$0x1] %vm63_vm10, %v62_v25  }
  0x88   :  { %v68_v26 = vpop.permute.xlu0 %67   ;;  %v74_v27 = vpop.permute.xlu1 %73  }
  0x89   :  { %70 = vst.msk [vmem:[#allocation0] sm:$0x1] %vm69_vm11, %v68_v26  }
  0x8a   :  { %76 = vst.msk [vmem:[#allocation0] sm:$0x1] %vm75_vm12, %v74_v27  }
  0x8c   :  { %v80_v28 = vpop.permute.xlu0 %79   ;;  %v86_v29 = vpop.permute.xlu1 %85  }
  0x8d   :  { %82 = vst.msk [vmem:[#allocation0] sm:$0x1] %vm81_vm13, %v80_v28  }
  0x8e   :  { %88 = vst.msk [vmem:[#allocation0] sm:$0x1] %vm87_vm14, %v86_v29  }
  0x90   :  { %v92_v30 = vpop.permute.xlu0 %91  }
  0x91   :  { %94 = vst.msk [vmem:[#allocation0] sm:$0x1] %vm93_vm15, %v92_v30  }
  0x98   :  { %v98_v31 = vld [vmem:[#allocation0] sm:$0x1] }
  0x99   :  { %100 = vst [vmem:[%s208_s1] sm:$0x1] %v98_v31 }

// kernel: resblock_forward.1
= control target key start
LH: loop header
LB: loop body
LE: loop exit
PB: predicated region body
PF: predicated region fallthrough
CT: control target
= control target key end

     0   :  { %v452_v3 = vmov 0   ;;  %s453_s30 = smov 64   ;;  %vm61_vm0 = vcmask 523264   ;;  %s636_s0 = inlined_call_operand.vmem [shape: f32[2,18,64], index: 0, kind: input, shape index: {}]   ;;  %s637_s1 = inlined_call_operand.vmem [shape: bf16[192,128], index: 1, kind: input, shape index: {}]   ;;  %s638_s2 = inlined_call_operand.vmem [shape: bf16[128,64], index: 2, kind: input, shape index: {}]   ;;  %s639_s3 = inlined_call_operand.vmem [shape: f32[1,128], index: 3, kind: input, shape index: {}]   ;;  %s640_s4 = inlined_call_operand.vmem [shape: f32[1,64], index: 4, kind: input, shape index: {}]   ;;  %s641_s5 = inlined_call_operand.vmem [shape: f32[32,64], index: 5, kind: output, shape index: {}]  }
   0x1   :  { %v487_v0 = vld [vmem:[%s636_s0 + $0x1] sm:$0xff]  ;;  %v492_v1 = vld [vmem:[%s636_s0 + $0x9] sm:$0xff]  ;;  %v497_v2 = vld [vmem:[%s636_s0 + $0x19] sm:$0xff]  ;;  %179 = vmatprep.subr.bf16.mxu0 %v452_v3 }
   0x2   :  { %v33_v4 = vmax.f32 %v487_v0, 0.0  ;;  %v34_v5 = vmax.f32 %v492_v1, 0.0  ;;  %v505_v6 = vld [vmem:[%s636_s0 + $0x21] sm:$0xff]  ;;  %v35_v7 = vmax.f32 %v497_v2, 0.0  ;;  %v434_v13 = vld [vmem:[%s637_s1 + $0x10] sm:$0xff]   ;;  %v435_v14 = vld [vmem:[%s637_s1 + $0x18] sm:$0xff]  }
   0x3   :  { %v36_v8 = vmax.f32 %v505_v6, 0.0  ;;  %v432_v9 = vld [vmem:[%s637_s1] sm:$0xff]   ;;  %v433_v11 = vld [vmem:[%s637_s1 + $0x8] sm:$0xff]   ;;  %v446_v24 = vld [vmem:[%s638_s2 + $0x10] sm:$0xff]  }
   0x4   :  { %v422_v10 = vpack.i.bf16 %v34_v5, %v33_v4  ;;  %180 = vmatpush1.bf16.msra.mxu0 %v432_v9  ;;  %v37_v15 = vld [vmem:[%s636_s0 + $0x2] sm:$0xff]  ;;  %v38_v16 = vld [vmem:[%s636_s0 + $0xa] sm:$0xff]  ;;  %v447_v26 = vld [vmem:[%s638_s2 + $0x18] sm:$0xff]  }
   0x5   :  { %v427_v12 = vpack.i.bf16 %v36_v8, %v35_v7  ;;  %181 = vmatprep.subr.bf16.mxu0 %v452_v3  ;;  %v41_v17 = vmax.f32 %v37_v15, 0.0  ;;  %v42_v18 = vmax.f32 %v38_v16, 0.0  ;;  %v436_v19 = vld [vmem:[%s637_s1 + $0x20] sm:$0xff]   ;;  %v445_v22 = vld [vmem:[%s638_s2 + $0x8] sm:$0xff]   ;;  %v438_v25 = vld [vmem:[%s637_s1 + $0x30] sm:$0xff]  }
   0x6   :  { %423 = vrot.lane.b32.xlu0 %v422_v10, %s453_s30  ;;  %v444_v21 = vld [vmem:[%s638_s2] sm:$0xff]   ;;  %v437_v23 = vld [vmem:[%s637_s1 + $0x28] sm:$0xff]   ;;  %v439_v27 = vld [vmem:[%s637_s1 + $0x38] sm:$0xff]  }
   0x7   :  { %v67_v20 = vpack.c.bf16 %v42_v18, %v41_v17  ;;  %400 = vmatprep.subr.bf16.mxu1 %v444_v21  ;;  %v440_v28 = vld [vmem:[%s637_s1 + $0x40] sm:$0xff]   ;;  %v441_v29 = vld [vmem:[%s637_s1 + $0x48] sm:$0xff]   ;;  %v442_v30 = vld [vmem:[%s637_s1 + $0x50] sm:$0xff]  }
   0x8   :  { %182 = vmatpush1.bf16.msra.mxu0 %v433_v11  ;;  %401 = vmatpush3.bf16.msra.mxu1 %v444_v21  ;;  %v443_v31 = vld [vmem:[%s637_s1 + $0x58] sm:$0xff]   ;;  %v21_v32 = vld [vmem:[%s636_s0] sm:$0xff]  ;;  %v22_v33 = vld [vmem:[%s636_s0 + $0x8] sm:$0xff] }
   0x9   :  { %183 = vmatprep.subr.bf16.mxu0 %v452_v3  ;;  %379 = vmatprep.mubr.msk.bf16.mxu0 %vm61_vm0, %v67_v20  ;;  %v39_v34 = vld [vmem:[%s636_s0 + $0x1a] sm:$0xff]  ;;  %v40_v35 = vld [vmem:[%s636_s0 + $0x22] sm:$0xff]  ;;  %v25_v36 = vmax.f32 %v21_v32, 0.0  ;;  %v26_v37 = vmax.f32 %v22_v33, 0.0  ;;  %v450_v59 = vld [vmem:[%s638_s2 + $0x30] sm:$0xff]  }
   0xa   :  { %428 = vrot.lane.b32.xlu0 %v427_v12, %s453_s30  ;;  %402 = vmatprep.subr.bf16.mxu1 %v445_v22  ;;  %v43_v38 = vmax.f32 %v39_v34, 0.0  ;;  %v44_v39 = vmax.f32 %v40_v35, 0.0  ;;  %v23_v40 = vld [vmem:[%s636_s0 + $0x18] sm:$0xff]  ;;  %v24_v42 = vld [vmem:[%s636_s0 + $0x20] sm:$0xff]  ;;  %v449_v58 = vld [vmem:[%s638_s2 + $0x28] sm:$0xff]  }
   0xb   :  { %v27_v45 = vmax.f32 %v23_v40, 0.0  ;;  %v28_v49 = vmax.f32 %v24_v42, 0.0  ;;  %v448_v57 = vld [vmem:[%s638_s2 + $0x20] sm:$0xff]   ;;  %v451_v60 = vld [vmem:[%s638_s2 + $0x38] sm:$0xff]  }
   0xc   :  { %184 = vmatpush1.bf16.msra.mxu0 %v434_v13  ;;  %403 = vmatpush3.bf16.msra.mxu1 %v445_v22  ;;  %v69_v48 = vpack.c.bf16 %v44_v39, %v43_v38  ;;  %v366_v61 = vld [vmem:[%s639_s3] ss:$0 sm:$0xff] }
   0xd   :  { %185 = vmatprep.subr.bf16.mxu0 %v452_v3  ;;  %404 = vmatprep.subr.bf16.mxu1 %v446_v24  ;;  %v381_v20 = vld [vmem:[%s640_s4] ss:$0 sm:$0xff] }
  0x10   :  { %186 = vmatpush1.bf16.msra.mxu0 %v435_v14  ;;  %405 = vmatpush3.bf16.msra.mxu1 %v446_v24 }
  0x11   :  { %187 = vmatprep.subr.bf16.mxu0 %v452_v3  ;;  %406 = vmatprep.subr.bf16.mxu1 %v447_v26 }
  0x14   :  { %188 = vmatpush1.bf16.msra.mxu0 %v436_v19  ;;  %407 = vmatpush3.bf16.msra.mxu1 %v447_v26 }
  0x15   :  { %189 = vmatprep.subr.bf16.mxu0 %v452_v3  ;;  %408 = vmatprep.subr.bf16.mxu1 %v448_v57 }
  0x18   :  { %190 = vmatpush1.bf16.msra.mxu0 %v437_v23  ;;  %409 = vmatpush3.bf16.msra.mxu1 %v448_v57 }
  0x19   :  { %191 = vmatprep.subr.bf16.mxu0 %v452_v3  ;;  %410 = vmatprep.subr.bf16.mxu1 %v449_v58 }
  0x1c   :  { %192 = vmatpush1.bf16.msra.mxu0 %v438_v25  ;;  %411 = vmatpush3.bf16.msra.mxu1 %v449_v58 }
  0x1d   :  { %193 = vmatprep.subr.bf16.mxu0 %v452_v3  ;;  %412 = vmatprep.subr.bf16.mxu1 %v450_v59 }
  0x20   :  { %194 = vmatpush1.bf16.msra.mxu0 %v439_v27  ;;  %413 = vmatpush3.bf16.msra.mxu1 %v450_v59 }
  0x21   :  { %195 = vmatprep.subr.bf16.mxu0 %v452_v3  ;;  %414 = vmatprep.subr.bf16.mxu1 %v451_v60 }
  0x24   :  { %196 = vmatpush1.bf16.msra.mxu0 %v440_v28  ;;  %415 = vmatpush3.bf16.msra.mxu1 %v451_v60 }
  0x25   :  { %197 = vmatprep.subr.bf16.mxu0 %v452_v3 }
  0x28   :  { %198 = vmatpush1.bf16.msra.mxu0 %v441_v29 }
  0x29   :  { %199 = vmatprep.subr.bf16.mxu0 %v452_v3 }
  0x2c   :  { %200 = vmatpush1.bf16.msra.mxu0 %v442_v30 }
  0x2d   :  { %201 = vmatprep.subr.bf16.mxu0 %v452_v3 }
  0x30   :  { %202 = vmatpush1.bf16.msra.mxu0 %v443_v31 }
  0x78   :  { %v424_v41 = vpop.permute.xlu0 %423 }
  0x79   :  { %v426_v43 = vunpack.i.h.bf16 %v424_v41  ;;  %v425_v44 = vunpack.i.l.bf16 %v424_v41 }
  0x7b   :  { %v62_v46 = vsel %vm61_vm0, %v25_v36, %v425_v44  ;;  %v63_v47 = vsel %vm61_vm0, %v26_v37, %v426_v43 }
  0x7c   :  { %v66_v50 = vpack.c.bf16 %v63_v47, %v62_v46  ;;  %v429_v51 = vpop.permute.xlu0 %428 }
  0x7d   :  { %v431_v52 = vunpack.i.h.bf16 %v429_v51  ;;  %v430_v53 = vunpack.i.l.bf16 %v429_v51 }
  0x7e   :  { %212 = vmatmul.mubr.bf16.vlgmr.msra.gmra.mrb[0].mxu0 %v66_v50 }
  0x7f   :  { %380 = vmatprep.mubr.msk.bf16.mxu0 %vm61_vm0, %v69_v48  ;;  %v64_v54 = vsel %vm61_vm0, %v27_v45, %v430_v53  ;;  %v65_v55 = vsel %vm61_vm0, %v28_v49, %v431_v52 }
  0x80   :  { %v68_v56 = vpack.c.bf16 %v65_v55, %v64_v54 }
  0x86   :  { %220 = vmatmul.mubr.bf16.gmra.mrb[4].mxu0 %v68_v56 }
 0x151   :  { %v213_v62 = vpop.f32.mrb[0].mxu0 }
 0x152   :  { %v214_v63 = vadd.f32 %v366_v61, %v213_v62  ;;  %v215_v3 = vpop.f32.mrb[1].mxu0 }
 0x153   :  { %v216_v4 = vpop.f32.mrb[2].mxu0 }
 0x154   :  { %v217_v5 = vadd.f32 %v366_v61, %v216_v4  ;;  %v218_v7 = vpop.f32.mrb[3].mxu0  ;;  %v228_v8 = vmax.f32 %v214_v63, 0.0 }
 0x156   :  { %v229_v9 = vmax.f32 %v217_v5, 0.0 }
 0x158   :  { %v232_v10 = vpack.c.bf16 %v229_v9, %v228_v8 }
 0x159   :  { %v221_v11 = vpop.f32.mrb[4].mxu0 }
 0x15a   :  { %v222_v12 = vadd.f32 %v366_v61, %v221_v11  ;;  %v223_v13 = vpop.f32.mrb[5].mxu0  ;;  %416 = vmatprep.mubr.bf16.mxu1 %v232_v10 }
 0x15b   :  { %v224_v14 = vpop.f32.mrb[6].mxu0 }
 0x15c   :  { %v225_v15 = vadd.f32 %v366_v61, %v224_v14  ;;  %v226_v16 = vpop.f32.mrb[7].mxu0  ;;  %v230_v17 = vmax.f32 %v222_v12, 0.0 }
 0x15e   :  { %v231_v18 = vmax.f32 %v225_v15, 0.0 }
 0x160   :  { %v233_v19 = vpack.c.bf16 %v231_v18, %v230_v17 }
 0x162   :  { %417 = vmatmul.mubr.bf16.vlgmr.msra.gmra.mrb[0].mxu1 %v233_v19 }
 0x235   :  { %v418_v21 = vpop.f32.mrb[0].mxu1 }
 0x236   :  { %v348_v22 = vadd.f32 %v418_v21, %v381_v20  ;;  %v339_v23 = vpop.f32.mrb[1].mxu1 }
 0x237   :  { %v340_v24 = vadd.f32 %v381_v20, %v339_v23  ;;  %v419_v25 = vpop.f32.mrb[2].mxu1 }
 0x238   :  { %v356_v26 = vadd.f32 %v348_v22, %v497_v2  ;;  %v351_v27 = vadd.f32 %v419_v25, %v381_v20  ;;  %v342_v28 = vpop.f32.mrb[3].mxu1 }
 0x239   :  { %v354_v29 = vadd.f32 %v340_v24, %v487_v0  ;;  %v343_v30 = vadd.f32 %v381_v20, %v342_v28 }
 0x23a   :  { %360 = vst.msk [vmem:[%s641_s5 + $0x10] sm:$0xff] %vm61_vm0, %v356_v26  ;;  %v357_v31 = vadd.f32 %v351_v27, %v505_v6 }
 0x23b   :  { %358 = vst.msk [vmem:[%s641_s5] sm:$0xff] %vm61_vm0, %v354_v29  ;;  %v355_v32 = vadd.f32 %v343_v30, %v492_v1 }
 0x23c   :  { %361 = vst.msk [vmem:[%s641_s5 + $0x18] sm:$0xff] %vm61_vm0, %v357_v31 }
 0x23d   :  { %359 = vst.msk [vmem:[%s641_s5 + $0x8] sm:$0xff] %vm61_vm0, %v355_v32 }

</bundles_post_ra>
